<compile_context>
chip_gen: v7x
topology: tpu7x:2x2x1
jax: 0.10.0
libtpu: 0.0.40
codegen_flags: <defaults>
</compile_context>

<pallas_src>
import functools

import jax
import jax.numpy as jnp
from jax.experimental import pallas as pl
from jax.experimental.pallas import tpu as pltpu

KSIZE = 7
PAD = 3
KROWS = 8            # each kh-group padded to 8 rows -> full (8,128) sublane tiles
REP = 128            # lane replication for the tiny channel-attention matmuls
BN_EPS = 1e-5


def _attn_block_kernel(x_ref, bn_scale_ref, bn_shift_ref, fc1w_ref, fc1b_ref,
                       fc2w_ref, fc2b_ref, wc_ref, cmask_ref, bc_ref,
                       o_ref, apad_ref, *, H, W, guard):
    # x_ref:      (1, C, H*W)  one sample; channels on sublanes, flat spatial on lanes
    # bn_scale:   (C, 1)       gamma * rsqrt(var + eps)
    # bn_shift:   (C, 1)       beta - mean * bn_scale
    # fc1w/fc1b:  (R, C) / (R, 1)   channel-attention FC1
    # fc2w/fc2b:  (C, R) / (C, 1)   channel-attention FC2
    # wc_ref:     (56, C)      7x7 conv taps, row = kh*8 + kw (kw==7 row is zero)
    # cmask_ref:  (7, H*W)     per-kw column-validity masks (grid invariant)
    # bc_ref:     (1,) SMEM    conv bias scalar
    # apad_ref:   (8, H*W + 2*guard) scratch: per-kw accumulator with zero guards
    HW = H * W
    x = x_ref[0].astype(jnp.float32)                                   # (C, HW)

    # ---- channel attention (fused: no extra HBM pass over x) ---------------
    pooled = jnp.sum(x, axis=1, keepdims=True) * (1.0 / HW)            # (C, 1)
    pooled = jnp.broadcast_to(pooled, (pooled.shape[0], REP))          # (C, REP)
    h = jnp.dot(fc1w_ref[...], pooled, preferred_element_type=jnp.float32)
    h = h + fc1b_ref[...]
    h = h * jax.nn.sigmoid(h)                                          # SiLU, (R, REP)
    ca = jnp.dot(fc2w_ref[...], h, preferred_element_type=jnp.float32)
    ca = jax.nn.sigmoid(ca + fc2b_ref[...])[:, 0:1]                    # (C, 1)
    scale = ca * bn_scale_ref[...]                                     # (C, 1)

    # ---- spatial attention: 7x7 (C -> 1) conv -------------------------------
    # One MXU matmul does the channel reduction for every tap:
    #   r[kh*8 + kw, p] = sum_c w[kh, kw, c] * x[c, p]   (row kh*8+7 is zero).
    r = jnp.dot(wc_ref[...], x, preferred_element_type=jnp.float32)    # (56, HW)

    # Shifted-slab accumulation: scratch row kw accumulates sum_kh r[kh,kw,.]
    # with the dh*W shift baked into the (full-sublane, 8 x HW) store offset.
    # Vertical overflow lands in the zeroed guard bands and is never read back;
    # stores/loads are lane-aligned whenever W % 128 == 0.
    apad_ref[...] = jnp.zeros_like(apad_ref)       # needed: kh groups accumulate
    for kh in range(KSIZE):
        lo = guard - (kh - PAD) * W
        apad_ref[:, lo:lo + HW] += r[kh * KROWS:(kh + 1) * KROWS, :]

    # Residual +-3-lane kw shift + column mask: 7 cheap row ops (mask multiply,
    # no selects).  TODO(synk): a strided pltpu.roll over the kw axis would
    # move these last per-row shifts onto the XLU as one full-sublane op.
    acc = jnp.zeros((1, HW), jnp.float32)
    for kw in range(KSIZE):
        dw = kw - PAD
        shifted = apad_ref[kw:kw + 1, guard + dw:guard + dw + HW]       # (1, HW)
        acc = acc + cmask_ref[kw:kw + 1, :] * shifted
    sa = jax.nn.sigmoid(acc + bc_ref[0])                                # (1, HW)

    # ---- gate + folded eval-mode BatchNorm + residual + SiLU ----------------
    y = (x * sa) * scale + bn_shift_ref[...]                            # (C, HW)
    z = y + x
    o_ref[0] = (z * jax.nn.sigmoid(z)).astype(o_ref.dtype)


def attention_block(x_nchw, params):
    """Forward pass of AttentionBlock. x_nchw: (B, C, H, W). Returns (B, C, H, W)."""
    (fc1_w, fc1_b, fc2_w, fc2_b, conv_w, conv_b,
     bn_gamma, bn_beta, bn_mean, bn_var) = params
    B, C, H, W = x_nchw.shape
    HW = H * W
    R = fc1_w.shape[0]

    # ---- fold inference-mode BatchNorm into per-channel scale / shift -------
    bn_scale = bn_gamma * jax.lax.rsqrt(bn_var + BN_EPS)                # (C,)
    bn_shift = (bn_beta - bn_mean * bn_scale)[:, None]                  # (C, 1)
    bn_scale = bn_scale[:, None]                                        # (C, 1)

    # conv taps kh-major with one zero pad row per kh group -> (56, C), so each
    # kh group of the matmul result is an aligned, full-sublane (8, HW) slab.
    wck = jnp.transpose(conv_w[0], (1, 2, 0))                           # (7, 7, C)
    wck = jnp.concatenate(
        [wck, jnp.zeros((KSIZE, KROWS - KSIZE, C), conv_w.dtype)], axis=1)
    wc = wck.reshape(KSIZE * KROWS, C)                                  # (56, C)
    bc = conv_b.reshape(1)

    # Grid-invariant per-kw column masks, built once here (not per grid step).
    col = (jnp.arange(HW, dtype=jnp.int32) % W)[None, :]                # (1, HW)
    dws = jnp.arange(KSIZE, dtype=jnp.int32)[:, None] - PAD             # (7, 1)
    cmask = ((col + dws >= 0) & (col + dws < W)).astype(jnp.float32)    # (7, HW)

    # NCHW -> (B, C, H*W): contiguous reshape (free), no layout transposes.
    # NOTE: keeping H*W a multiple of 128 keeps all stores lane-dense.
    x_flat = x_nchw.reshape(B, C, HW)

    # Guard band >= PAD*W + PAD on each side of the flat row, rounded to lanes.
    guard = ((PAD * W + PAD + 127) // 128) * 128

    # Per-generation VMEM limit: ~3/4 of physical (v5e/v6e ~96 MiB, v7x ~48 MiB).
    try:
        vmem_cap = pltpu.get_tpu_info().vmem_capacity_bytes
        vmem_limit = int(min(100 * 1024 * 1024, vmem_cap * 3 // 4))
    except Exception:  # conservative fallback if the query is unavailable
        vmem_limit = 48 * 1024 * 1024

    kernel = functools.partial(_attn_block_kernel, H=H, W=W, guard=guard)
    cost = pl.CostEstimate(
        flops=int(B * (2 * KSIZE * KROWS * C * HW + (KROWS + 3) * KSIZE * HW
                       + 10 * C * HW + 4 * R * C)),
        transcendentals=int(B * (HW * (C + 1) + R + 2 * C)),
        bytes_accessed=int(4 * (2 * B * C * HW + KSIZE * HW
                                + KSIZE * KROWS * C + 2 * R * C + 6 * C)),
    )

    out_flat = pl.pallas_call(
        kernel,
        out_shape=jax.ShapeDtypeStruct((B, C, HW), x_nchw.dtype),
        grid_spec=pltpu.PrefetchScalarGridSpec(
            num_scalar_prefetch=0,
            grid=(B,),
            in_specs=[
                pl.BlockSpec((1, C, HW), lambda b: (b, 0, 0)),           # x
                pl.BlockSpec((C, 1), lambda b: (0, 0)),                  # bn scale
                pl.BlockSpec((C, 1), lambda b: (0, 0)),                  # bn shift
                pl.BlockSpec((R, C), lambda b: (0, 0)),                  # fc1 w
                pl.BlockSpec((R, 1), lambda b: (0, 0)),                  # fc1 b
                pl.BlockSpec((C, R), lambda b: (0, 0)),                  # fc2 w
                pl.BlockSpec((C, 1), lambda b: (0, 0)),                  # fc2 b
                pl.BlockSpec((KSIZE * KROWS, C), lambda b: (0, 0)),      # conv taps
                pl.BlockSpec((KSIZE, HW), lambda b: (0, 0)),             # col masks
                pl.BlockSpec(memory_space=pltpu.MemorySpace.SMEM),       # conv bias
            ],
            out_specs=pl.BlockSpec((1, C, HW), lambda b: (b, 0, 0)),
            scratch_shapes=[
                pltpu.VMEM((KROWS, HW + 2 * guard), jnp.float32),
            ],
        ),
        # Batch axis is "parallel" so v7x's two TensorCores are both fed for
        # even B (the H-tile axis in the TODO above extends this).
        compiler_params=pltpu.CompilerParams(
            dimension_semantics=("parallel",),
            vmem_limit_bytes=vmem_limit,
        ),
        cost_estimate=cost,
    )(x_flat, bn_scale, bn_shift, fc1_w, fc1_b[:, None], fc2_w, fc2_b[:, None],
      wc, cmask, bc)

    return out_flat.reshape(B, C, H, W)


def init_params(key, channels, reduction_ratio=8):
    """Deterministic init matching the PyTorch module's shapes / init scheme."""
    reduced = max(channels // reduction_ratio, 32)
    keys = jax.random.split(key, 8)
    xavier = (2.0 / (channels + reduced)) ** 0.5
    fc1_w = xavier * jax.random.normal(keys[0], (reduced, channels), jnp.float32)
    fc1_b = jnp.zeros((reduced,), jnp.float32)
    fc2_w = xavier * jax.random.normal(keys[1], (channels, reduced), jnp.float32)
    fc2_b = jnp.zeros((channels,), jnp.float32)
    fan_out = 1 * KSIZE * KSIZE                       # kaiming_normal_, mode='fan_out'
    conv_w = (2.0 / fan_out) ** 0.5 * jax.random.normal(
        keys[2], (1, channels, KSIZE, KSIZE), jnp.float32)
    fan_in = channels * KSIZE * KSIZE                 # default PyTorch conv bias init
    bound = 1.0 / fan_in ** 0.5
    conv_b = jax.random.uniform(keys[3], (1,), jnp.float32, -bound, bound)
    # BatchNorm2d affine params + (simulated trained) running statistics.
    bn_gamma = 1.0 + 0.1 * jax.random.normal(keys[4], (channels,), jnp.float32)
    bn_beta = 0.1 * jax.random.normal(keys[5], (channels,), jnp.float32)
    bn_mean = 0.1 * jax.random.normal(keys[6], (channels,), jnp.float32)
    bn_var = jax.random.uniform(keys[7], (channels,), jnp.float32, 0.5, 1.5)
    return (fc1_w, fc1_b, fc2_w, fc2_b, conv_w, conv_b,
            bn_gamma, bn_beta, bn_mean, bn_var)


def reference(x, params):
    """Pure-JAX reference of the AttentionBlock forward (NCHW, eval-mode BN)."""
    (fc1_w, fc1_b, fc2_w, fc2_b, conv_w, conv_b,
     bn_gamma, bn_beta, bn_mean, bn_var) = params
    pooled = jnp.mean(x, axis=(2, 3))                                    # (B, C)
    h = pooled @ fc1_w.T + fc1_b
    h = h * jax.nn.sigmoid(h)
    ca = jax.nn.sigmoid(h @ fc2_w.T + fc2_b)                             # (B, C)
    sa = jax.lax.conv_general_dilated(
        x, conv_w, window_strides=(1, 1),
        padding=((PAD, PAD), (PAD, PAD)),
        dimension_numbers=("NCHW", "OIHW", "NCHW")) + conv_b.reshape(1, 1, 1, 1)
    sa = jax.nn.sigmoid(sa)
    att = x * ca[:, :, None, None] * sa
    inv = (bn_gamma * jax.lax.rsqrt(bn_var + BN_EPS))[None, :, None, None]
    bn = (att - bn_mean[None, :, None, None]) * inv + bn_beta[None, :, None, None]
    z = bn + x
    return z * jax.nn.sigmoid(z)


if __name__ == "__main__":
    key = jax.random.PRNGKey(0)
    kp, kx = jax.random.split(key)
    B, C, H, W = 2, 4, 16, 16
    params = init_params(kp, C, reduction_ratio=8)
    x = jax.random.normal(kx, (B, C, H, W), jnp.float32)

    fwd = jax.jit(attention_block)
    out = jax.block_until_ready(fwd(x, params))
    ref = reference(x, params)

    assert out.shape == (B, C, H, W) and out.dtype == jnp.float32
    err = float(jnp.max(jnp.abs(out - ref)))
    assert jnp.allclose(out, ref, rtol=2e-4, atol=2e-5), f"max abs err = {err}"
    print("KERNEL_OK")
</pallas_src>

<mosaic_0001>
module attributes {stable_mosaic.version = 11 : i64} {
  func.func @_attn_block_kernel(%arg0: i32, %arg1: memref<1x4x256xf32, #tpu.memory_space<vmem>>, %arg2: memref<4x1xf32, #tpu.memory_space<vmem>>, %arg3: memref<4x1xf32, #tpu.memory_space<vmem>>, %arg4: memref<32x4xf32, #tpu.memory_space<vmem>>, %arg5: memref<32x1xf32, #tpu.memory_space<vmem>>, %arg6: memref<4x32xf32, #tpu.memory_space<vmem>>, %arg7: memref<4x1xf32, #tpu.memory_space<vmem>>, %arg8: memref<56x4xf32, #tpu.memory_space<vmem>>, %arg9: memref<7x256xf32, #tpu.memory_space<vmem>>, %arg10: memref<1xf32, #tpu.memory_space<smem>>, %arg11: memref<1x4x256xf32, #tpu.memory_space<vmem>>, %arg12: memref<8x512xf32, #tpu.memory_space<vmem>>) attributes {dimension_semantics = [#tpu.dimension_semantics<parallel>], iteration_bounds = array<i64: 2>, scalar_prefetch = 0 : i64, scratch_operands = 1 : i64, tpu.core_type = #tpu.core_type<tc>, window_params = [{transform_indices = @transform_0, window_bounds = array<i64: 1, 4, 256>}, {pipeline_mode = #tpu.pipeline_mode<synchronous>, transform_indices = @transform_1, window_bounds = array<i64: 4, 1>}, {pipeline_mode = #tpu.pipeline_mode<synchronous>, transform_indices = @transform_2, window_bounds = array<i64: 4, 1>}, {pipeline_mode = #tpu.pipeline_mode<synchronous>, transform_indices = @transform_3, window_bounds = array<i64: 32, 4>}, {pipeline_mode = #tpu.pipeline_mode<synchronous>, transform_indices = @transform_4, window_bounds = array<i64: 32, 1>}, {pipeline_mode = #tpu.pipeline_mode<synchronous>, transform_indices = @transform_5, window_bounds = array<i64: 4, 32>}, {pipeline_mode = #tpu.pipeline_mode<synchronous>, transform_indices = @transform_6, window_bounds = array<i64: 4, 1>}, {pipeline_mode = #tpu.pipeline_mode<synchronous>, transform_indices = @transform_7, window_bounds = array<i64: 56, 4>}, {pipeline_mode = #tpu.pipeline_mode<synchronous>, transform_indices = @transform_8, window_bounds = array<i64: 7, 256>}, {transform_indices = @transform_9, window_bounds = array<i64: 1>}, {transform_indices = @transform_10, window_bounds = array<i64: 1, 4, 256>}]} {
    %c0 = arith.constant 0 : index
    %c0_0 = arith.constant 0 : index
    %c0_1 = arith.constant 0 : index
    %0 = vector.load %arg1[%c0, %c0_0, %c0_1] : memref<1x4x256xf32, #tpu.memory_space<vmem>>, vector<1x4x256xf32>
    %1 = vector.shape_cast %0 : vector<1x4x256xf32> to vector<4x256xf32>
    %cst = arith.constant dense<0.000000e+00> : vector<4xf32>
    %2 = vector.multi_reduction <add>, %1, %cst [1] : vector<4x256xf32> to vector<4xf32>
    %3 = vector.shape_cast %2 : vector<4xf32> to vector<4x1xf32>
    %cst_2 = arith.constant 3.906250e-03 : f32
    %4 = vector.broadcast %cst_2 : f32 to vector<4x1xf32>
    %5 = arith.mulf %3, %4 : vector<4x1xf32>
    %6 = vector.shape_cast %5 : vector<4x1xf32> to vector<4x1xf32>
    %7 = vector.broadcast %6 : vector<4x1xf32> to vector<4x128xf32>
    %c0_3 = arith.constant 0 : index
    %c0_4 = arith.constant 0 : index
    %8 = vector.load %arg4[%c0_3, %c0_4] : memref<32x4xf32, #tpu.memory_space<vmem>>, vector<32x4xf32>
    %cst_5 = arith.constant dense<0.000000e+00> : vector<32x128xf32>
    %9 = tpu.matmul %8, %7, %cst_5 {dimension_numbers = #tpu.dot_dimension_numbers<[1], [0], [0], [1], [0, 0, 1, 1], [], []>} : vector<32x4xf32>, vector<4x128xf32>, vector<32x128xf32> -> vector<32x128xf32>
    %c0_6 = arith.constant 0 : index
    %c0_7 = arith.constant 0 : index
    %10 = vector.load %arg5[%c0_6, %c0_7] : memref<32x1xf32, #tpu.memory_space<vmem>>, vector<32x1xf32>
    %11 = vector.broadcast %10 : vector<32x1xf32> to vector<32x128xf32>
    %12 = arith.addf %9, %11 : vector<32x128xf32>
    %13 = arith.negf %12 : vector<32x128xf32>
    %14 = math.exp %13 : vector<32x128xf32>
    %cst_8 = arith.constant 1.000000e+00 : f32
    %15 = vector.broadcast %cst_8 : f32 to vector<32x128xf32>
    %16 = arith.addf %15, %14 : vector<32x128xf32>
    %17 = arith.divf %15, %16 : vector<32x128xf32>
    %18 = arith.mulf %12, %17 : vector<32x128xf32>
    %c0_9 = arith.constant 0 : index
    %c0_10 = arith.constant 0 : index
    %19 = vector.load %arg6[%c0_9, %c0_10] : memref<4x32xf32, #tpu.memory_space<vmem>>, vector<4x32xf32>
    %cst_11 = arith.constant dense<0.000000e+00> : vector<4x128xf32>
    %20 = tpu.matmul %19, %18, %cst_11 {dimension_numbers = #tpu.dot_dimension_numbers<[1], [0], [0], [1], [0, 0, 1, 1], [], []>} : vector<4x32xf32>, vector<32x128xf32>, vector<4x128xf32> -> vector<4x128xf32>
    %c0_12 = arith.constant 0 : index
    %c0_13 = arith.constant 0 : index
    %21 = vector.load %arg7[%c0_12, %c0_13] : memref<4x1xf32, #tpu.memory_space<vmem>>, vector<4x1xf32>
    %22 = vector.broadcast %21 : vector<4x1xf32> to vector<4x128xf32>
    %23 = arith.addf %20, %22 : vector<4x128xf32>
    %24 = arith.negf %23 : vector<4x128xf32>
    %25 = math.exp %24 : vector<4x128xf32>
    %cst_14 = arith.constant 1.000000e+00 : f32
    %26 = vector.broadcast %cst_14 : f32 to vector<4x128xf32>
    %27 = arith.addf %26, %25 : vector<4x128xf32>
    %28 = arith.divf %26, %27 : vector<4x128xf32>
    %29 = vector.extract_strided_slice %28 {offsets = [0, 0], sizes = [4, 1], strides = [1, 1]} : vector<4x128xf32> to vector<4x1xf32>
    %c0_15 = arith.constant 0 : index
    %c0_16 = arith.constant 0 : index
    %30 = vector.load %arg2[%c0_15, %c0_16] : memref<4x1xf32, #tpu.memory_space<vmem>>, vector<4x1xf32>
    %31 = arith.mulf %29, %30 : vector<4x1xf32>
    %c0_17 = arith.constant 0 : index
    %c0_18 = arith.constant 0 : index
    %32 = vector.load %arg8[%c0_17, %c0_18] : memref<56x4xf32, #tpu.memory_space<vmem>>, vector<56x4xf32>
    %cst_19 = arith.constant dense<0.000000e+00> : vector<56x256xf32>
    %33 = tpu.matmul %32, %1, %cst_19 {dimension_numbers = #tpu.dot_dimension_numbers<[1], [0], [0], [1], [0, 0, 1, 1], [], []>} : vector<56x4xf32>, vector<4x256xf32>, vector<56x256xf32> -> vector<56x256xf32>
    %cst_20 = arith.constant 0.000000e+00 : f32
    %34 = vector.broadcast %cst_20 : f32 to vector<8x512xf32>
    %c0_21 = arith.constant 0 : index
    %c0_22 = arith.constant 0 : index
    %35 = vector.load %arg12[%c0_21, %c0_22] : memref<8x512xf32, #tpu.memory_space<vmem>>, vector<8x512xf32>
    tpu.vector_store %arg12[%c0_21, %c0_22], %34 {strides = array<i32>} : memref<8x512xf32, #tpu.memory_space<vmem>>, vector<8x512xf32>,
    %c0_23 = arith.constant 0 : index
    %c176 = arith.constant 176 : index
    %36 = vector.load %arg12[%c0_23, %c176] : memref<8x512xf32, #tpu.memory_space<vmem>>, vector<8x256xf32>
    %37 = vector.extract_strided_slice %33 {offsets = [0, 0], sizes = [8, 256], strides = [1, 1]} : vector<56x256xf32> to vector<8x256xf32>
    %38 = arith.addf %36, %37 : vector<8x256xf32>
    %c0_24 = arith.constant 0 : index
    %c176_25 = arith.constant 176 : index
    %39 = vector.load %arg12[%c0_24, %c176_25] : memref<8x512xf32, #tpu.memory_space<vmem>>, vector<8x256xf32>
    tpu.vector_store %arg12[%c0_24, %c176_25], %38 {strides = array<i32>} : memref<8x512xf32, #tpu.memory_space<vmem>>, vector<8x256xf32>,
    %c0_26 = arith.constant 0 : index
    %c160 = arith.constant 160 : index
    %40 = vector.load %arg12[%c0_26, %c160] : memref<8x512xf32, #tpu.memory_space<vmem>>, vector<8x256xf32>
    %41 = vector.extract_strided_slice %33 {offsets = [8, 0], sizes = [8, 256], strides = [1, 1]} : vector<56x256xf32> to vector<8x256xf32>
    %42 = arith.addf %40, %41 : vector<8x256xf32>
    %c0_27 = arith.constant 0 : index
    %c160_28 = arith.constant 160 : index
    %43 = vector.load %arg12[%c0_27, %c160_28] : memref<8x512xf32, #tpu.memory_space<vmem>>, vector<8x256xf32>
    tpu.vector_store %arg12[%c0_27, %c160_28], %42 {strides = array<i32>} : memref<8x512xf32, #tpu.memory_space<vmem>>, vector<8x256xf32>,
    %c0_29 = arith.constant 0 : index
    %c144 = arith.constant 144 : index
    %44 = vector.load %arg12[%c0_29, %c144] : memref<8x512xf32, #tpu.memory_space<vmem>>, vector<8x256xf32>
    %45 = vector.extract_strided_slice %33 {offsets = [16, 0], sizes = [8, 256], strides = [1, 1]} : vector<56x256xf32> to vector<8x256xf32>
    %46 = arith.addf %44, %45 : vector<8x256xf32>
    %c0_30 = arith.constant 0 : index
    %c144_31 = arith.constant 144 : index
    %47 = vector.load %arg12[%c0_30, %c144_31] : memref<8x512xf32, #tpu.memory_space<vmem>>, vector<8x256xf32>
    tpu.vector_store %arg12[%c0_30, %c144_31], %46 {strides = array<i32>} : memref<8x512xf32, #tpu.memory_space<vmem>>, vector<8x256xf32>,
    %c0_32 = arith.constant 0 : index
    %c128 = arith.constant 128 : index
    %48 = vector.load %arg12[%c0_32, %c128] : memref<8x512xf32, #tpu.memory_space<vmem>>, vector<8x256xf32>
    %49 = vector.extract_strided_slice %33 {offsets = [24, 0], sizes = [8, 256], strides = [1, 1]} : vector<56x256xf32> to vector<8x256xf32>
    %50 = arith.addf %48, %49 : vector<8x256xf32>
    %c0_33 = arith.constant 0 : index
    %c128_34 = arith.constant 128 : index
    %51 = vector.load %arg12[%c0_33, %c128_34] : memref<8x512xf32, #tpu.memory_space<vmem>>, vector<8x256xf32>
    tpu.vector_store %arg12[%c0_33, %c128_34], %50 {strides = array<i32>} : memref<8x512xf32, #tpu.memory_space<vmem>>, vector<8x256xf32>,
    %c0_35 = arith.constant 0 : index
    %c112 = arith.constant 112 : index
    %52 = vector.load %arg12[%c0_35, %c112] : memref<8x512xf32, #tpu.memory_space<vmem>>, vector<8x256xf32>
    %53 = vector.extract_strided_slice %33 {offsets = [32, 0], sizes = [8, 256], strides = [1, 1]} : vector<56x256xf32> to vector<8x256xf32>
    %54 = arith.addf %52, %53 : vector<8x256xf32>
    %c0_36 = arith.constant 0 : index
    %c112_37 = arith.constant 112 : index
    %55 = vector.load %arg12[%c0_36, %c112_37] : memref<8x512xf32, #tpu.memory_space<vmem>>, vector<8x256xf32>
    tpu.vector_store %arg12[%c0_36, %c112_37], %54 {strides = array<i32>} : memref<8x512xf32, #tpu.memory_space<vmem>>, vector<8x256xf32>,
    %c0_38 = arith.constant 0 : index
    %c96 = arith.constant 96 : index
    %56 = vector.load %arg12[%c0_38, %c96] : memref<8x512xf32, #tpu.memory_space<vmem>>, vector<8x256xf32>
    %57 = vector.extract_strided_slice %33 {offsets = [40, 0], sizes = [8, 256], strides = [1, 1]} : vector<56x256xf32> to vector<8x256xf32>
    %58 = arith.addf %56, %57 : vector<8x256xf32>
    %c0_39 = arith.constant 0 : index
    %c96_40 = arith.constant 96 : index
    %59 = vector.load %arg12[%c0_39, %c96_40] : memref<8x512xf32, #tpu.memory_space<vmem>>, vector<8x256xf32>
    tpu.vector_store %arg12[%c0_39, %c96_40], %58 {strides = array<i32>} : memref<8x512xf32, #tpu.memory_space<vmem>>, vector<8x256xf32>,
    %c0_41 = arith.constant 0 : index
    %c80 = arith.constant 80 : index
    %60 = vector.load %arg12[%c0_41, %c80] : memref<8x512xf32, #tpu.memory_space<vmem>>, vector<8x256xf32>
    %61 = vector.extract_strided_slice %33 {offsets = [48, 0], sizes = [8, 256], strides = [1, 1]} : vector<56x256xf32> to vector<8x256xf32>
    %62 = arith.addf %60, %61 : vector<8x256xf32>
    %c0_42 = arith.constant 0 : index
    %c80_43 = arith.constant 80 : index
    %63 = vector.load %arg12[%c0_42, %c80_43] : memref<8x512xf32, #tpu.memory_space<vmem>>, vector<8x256xf32>
    tpu.vector_store %arg12[%c0_42, %c80_43], %62 {strides = array<i32>} : memref<8x512xf32, #tpu.memory_space<vmem>>, vector<8x256xf32>,
    %cst_44 = arith.constant 0.000000e+00 : f32
    %64 = vector.broadcast %cst_44 : f32 to vector<1x256xf32>
    %c0_45 = arith.constant 0 : index
    %c125 = arith.constant 125 : index
    %65 = vector.load %arg12[%c0_45, %c125] : memref<8x512xf32, #tpu.memory_space<vmem>>, vector<1x256xf32>
    %c0_46 = arith.constant 0 : index
    %c0_47 = arith.constant 0 : index
    %66 = vector.load %arg9[%c0_46, %c0_47] : memref<7x256xf32, #tpu.memory_space<vmem>>, vector<1x256xf32>
    %67 = arith.mulf %66, %65 : vector<1x256xf32>
    %68 = arith.addf %64, %67 : vector<1x256xf32>
    %c1 = arith.constant 1 : index
    %c126 = arith.constant 126 : index
    %69 = vector.load %arg12[%c1, %c126] : memref<8x512xf32, #tpu.memory_space<vmem>>, vector<1x256xf32>
    %c1_48 = arith.constant 1 : index
    %c0_49 = arith.constant 0 : index
    %70 = vector.load %arg9[%c1_48, %c0_49] : memref<7x256xf32, #tpu.memory_space<vmem>>, vector<1x256xf32>
    %71 = arith.mulf %70, %69 : vector<1x256xf32>
    %72 = arith.addf %68, %71 : vector<1x256xf32>
    %c2 = arith.constant 2 : index
    %c127 = arith.constant 127 : index
    %73 = vector.load %arg12[%c2, %c127] : memref<8x512xf32, #tpu.memory_space<vmem>>, vector<1x256xf32>
    %c2_50 = arith.constant 2 : index
    %c0_51 = arith.constant 0 : index
    %74 = vector.load %arg9[%c2_50, %c0_51] : memref<7x256xf32, #tpu.memory_space<vmem>>, vector<1x256xf32>
    %75 = arith.mulf %74, %73 : vector<1x256xf32>
    %76 = arith.addf %72, %75 : vector<1x256xf32>
    %c3 = arith.constant 3 : index
    %c128_52 = arith.constant 128 : index
    %77 = vector.load %arg12[%c3, %c128_52] : memref<8x512xf32, #tpu.memory_space<vmem>>, vector<1x256xf32>
    %c3_53 = arith.constant 3 : index
    %c0_54 = arith.constant 0 : index
    %78 = vector.load %arg9[%c3_53, %c0_54] : memref<7x256xf32, #tpu.memory_space<vmem>>, vector<1x256xf32>
    %79 = arith.mulf %78, %77 : vector<1x256xf32>
    %80 = arith.addf %76, %79 : vector<1x256xf32>
    %c4 = arith.constant 4 : index
    %c129 = arith.constant 129 : index
    %81 = vector.load %arg12[%c4, %c129] : memref<8x512xf32, #tpu.memory_space<vmem>>, vector<1x256xf32>
    %c4_55 = arith.constant 4 : index
    %c0_56 = arith.constant 0 : index
    %82 = vector.load %arg9[%c4_55, %c0_56] : memref<7x256xf32, #tpu.memory_space<vmem>>, vector<1x256xf32>
    %83 = arith.mulf %82, %81 : vector<1x256xf32>
    %84 = arith.addf %80, %83 : vector<1x256xf32>
    %c5 = arith.constant 5 : index
    %c130 = arith.constant 130 : index
    %85 = vector.load %arg12[%c5, %c130] : memref<8x512xf32, #tpu.memory_space<vmem>>, vector<1x256xf32>
    %c5_57 = arith.constant 5 : index
    %c0_58 = arith.constant 0 : index
    %86 = vector.load %arg9[%c5_57, %c0_58] : memref<7x256xf32, #tpu.memory_space<vmem>>, vector<1x256xf32>
    %87 = arith.mulf %86, %85 : vector<1x256xf32>
    %88 = arith.addf %84, %87 : vector<1x256xf32>
    %c6 = arith.constant 6 : index
    %c131 = arith.constant 131 : index
    %89 = vector.load %arg12[%c6, %c131] : memref<8x512xf32, #tpu.memory_space<vmem>>, vector<1x256xf32>
    %c6_59 = arith.constant 6 : index
    %c0_60 = arith.constant 0 : index
    %90 = vector.load %arg9[%c6_59, %c0_60] : memref<7x256xf32, #tpu.memory_space<vmem>>, vector<1x256xf32>
    %91 = arith.mulf %90, %89 : vector<1x256xf32>
    %92 = arith.addf %88, %91 : vector<1x256xf32>
    %c0_61 = arith.constant 0 : index
    %93 = memref.load %arg10[%c0_61] : memref<1xf32, #tpu.memory_space<smem>>
    %94 = vector.broadcast %93 : f32 to vector<1x256xf32>
    %95 = arith.addf %92, %94 : vector<1x256xf32>
    %96 = arith.negf %95 : vector<1x256xf32>
    %97 = math.exp %96 : vector<1x256xf32>
    %cst_62 = arith.constant 1.000000e+00 : f32
    %98 = vector.broadcast %cst_62 : f32 to vector<1x256xf32>
    %99 = arith.addf %98, %97 : vector<1x256xf32>
    %100 = arith.divf %98, %99 : vector<1x256xf32>
    %101 = vector.broadcast %100 : vector<1x256xf32> to vector<4x256xf32>
    %102 = arith.mulf %1, %101 : vector<4x256xf32>
    %103 = vector.broadcast %31 : vector<4x1xf32> to vector<4x256xf32>
    %104 = arith.mulf %102, %103 : vector<4x256xf32>
    %c0_63 = arith.constant 0 : index
    %c0_64 = arith.constant 0 : index
    %105 = vector.load %arg3[%c0_63, %c0_64] : memref<4x1xf32, #tpu.memory_space<vmem>>, vector<4x1xf32>
    %106 = vector.broadcast %105 : vector<4x1xf32> to vector<4x256xf32>
    %107 = arith.addf %104, %106 : vector<4x256xf32>
    %108 = arith.addf %107, %1 : vector<4x256xf32>
    %109 = arith.negf %108 : vector<4x256xf32>
    %110 = math.exp %109 : vector<4x256xf32>
    %cst_65 = arith.constant 1.000000e+00 : f32
    %111 = vector.broadcast %cst_65 : f32 to vector<4x256xf32>
    %112 = arith.addf %111, %110 : vector<4x256xf32>
    %113 = arith.divf %111, %112 : vector<4x256xf32>
    %114 = arith.mulf %108, %113 : vector<4x256xf32>
    %c0_66 = arith.constant 0 : index
    %c0_67 = arith.constant 0 : index
    %c0_68 = arith.constant 0 : index
    %115 = vector.load %arg11[%c0_66, %c0_67, %c0_68] : memref<1x4x256xf32, #tpu.memory_space<vmem>>, vector<1x4x256xf32>
    %116 = vector.shape_cast %115 : vector<1x4x256xf32> to vector<4x256xf32>
    %117 = vector.shape_cast %114 : vector<4x256xf32> to vector<1x4x256xf32>
    tpu.vector_store %arg11[%c0_66, %c0_67, %c0_68], %117 {strides = array<i32>} : memref<1x4x256xf32, #tpu.memory_space<vmem>>, vector<1x4x256xf32>,
    return
  }
  func.func @transform_0(%arg0: i32) -> (i32, i32, i32) {
    %c0_i32 = arith.constant 0 : i32
    %c0_i32_0 = arith.constant 0 : i32
    %c0_i32_1 = arith.constant 0 : i32
    return %arg0, %c0_i32, %c0_i32_0 : i32, i32, i32
  }
  func.func @transform_1(%arg0: i32) -> (i32, i32) {
    %c0_i32 = arith.constant 0 : i32
    %c0_i32_0 = arith.constant 0 : i32
    %c0_i32_1 = arith.constant 0 : i32
    return %c0_i32, %c0_i32_0 : i32, i32
  }
  func.func @transform_2(%arg0: i32) -> (i32, i32) {
    %c0_i32 = arith.constant 0 : i32
    %c0_i32_0 = arith.constant 0 : i32
    %c0_i32_1 = arith.constant 0 : i32
    return %c0_i32, %c0_i32_0 : i32, i32
  }
  func.func @transform_3(%arg0: i32) -> (i32, i32) {
    %c0_i32 = arith.constant 0 : i32
    %c0_i32_0 = arith.constant 0 : i32
    %c0_i32_1 = arith.constant 0 : i32
    return %c0_i32, %c0_i32_0 : i32, i32
  }
  func.func @transform_4(%arg0: i32) -> (i32, i32) {
    %c0_i32 = arith.constant 0 : i32
    %c0_i32_0 = arith.constant 0 : i32
    %c0_i32_1 = arith.constant 0 : i32
    return %c0_i32, %c0_i32_0 : i32, i32
  }
  func.func @transform_5(%arg0: i32) -> (i32, i32) {
    %c0_i32 = arith.constant 0 : i32
    %c0_i32_0 = arith.constant 0 : i32
    %c0_i32_1 = arith.constant 0 : i32
    return %c0_i32, %c0_i32_0 : i32, i32
  }
  func.func @transform_6(%arg0: i32) -> (i32, i32) {
    %c0_i32 = arith.constant 0 : i32
    %c0_i32_0 = arith.constant 0 : i32
    %c0_i32_1 = arith.constant 0 : i32
    return %c0_i32, %c0_i32_0 : i32, i32
  }
  func.func @transform_7(%arg0: i32) -> (i32, i32) {
    %c0_i32 = arith.constant 0 : i32
    %c0_i32_0 = arith.constant 0 : i32
    %c0_i32_1 = arith.constant 0 : i32
    return %c0_i32, %c0_i32_0 : i32, i32
  }
  func.func @transform_8(%arg0: i32) -> (i32, i32) {
    %c0_i32 = arith.constant 0 : i32
    %c0_i32_0 = arith.constant 0 : i32
    %c0_i32_1 = arith.constant 0 : i32
    return %c0_i32, %c0_i32_0 : i32, i32
  }
  func.func @transform_9(%arg0: i32) -> i32 {
    %c0_i32 = arith.constant 0 : i32
    %c0_i32_0 = arith.constant 0 : i32
    return %c0_i32 : i32
  }
  func.func @transform_10(%arg0: i32) -> (i32, i32, i32) {
    %c0_i32 = arith.constant 0 : i32
    %c0_i32_0 = arith.constant 0 : i32
    %c0_i32_1 = arith.constant 0 : i32
    return %arg0, %c0_i32, %c0_i32_0 : i32, i32, i32
  }
}

</mosaic_0001>

<bundles_post_ra>
// kernel: attention_block.1
= control target key start
LH: loop header
LB: loop body
LE: loop exit
PB: predicated region body
PF: predicated region fallthrough
CT: control target
= control target key end

     0   :  { %s1303_s15 = smov 0   ;;  %s1459_s0 = inlined_call_operand.vmem [shape: f32[2,4,256], index: 0, kind: input, shape index: {}]   ;;  %s1460_s1 = inlined_call_operand.vmem [shape: f32[4,1], index: 1, kind: input, shape index: {}]   ;;  %s1461_s2 = inlined_call_operand.vmem [shape: f32[4,1], index: 2, kind: input, shape index: {}]   ;;  %s1462_s3 = inlined_call_operand.vmem [shape: f32[32,4], index: 3, kind: input, shape index: {}]   ;;  %s1463_s4 = inlined_call_operand.vmem [shape: f32[32,1], index: 4, kind: input, shape index: {}]   ;;  %s1464_s5 = inlined_call_operand.vmem [shape: f32[4,32], index: 5, kind: input, shape index: {}]   ;;  %s1465_s6 = inlined_call_operand.vmem [shape: f32[4,1], index: 6, kind: input, shape index: {}]   ;;  %s1466_s7 = inlined_call_operand.vmem [shape: f32[56,4], index: 7, kind: input, shape index: {}]   ;;  %s1467_s8 = inlined_call_operand.vmem [shape: f32[7,256], index: 8, kind: input, shape index: {}]   ;;  %s1468_s9 = inlined_call_operand.<no memory space> [shape: f32[1], index: 9, kind: input, shape index: {}]   ;;  %s1469_s10 = inlined_call_operand.vmem [shape: f32[2,4,256], index: 10, kind: output, shape index: {}]  }
   0x1   :  { %15 = sst [smem:[#allocation3]] %s1468_s9 }
   0x2 LB: > { %s1086_s16 = sadd.s32 4294967295, %s1226_s15   ;;  %p1090_p0 = scmp.ge.s32.totalorder %s1226_s15, 1  ;;  %s1226_s15 = sphi %s1303_s15, %s21_s15  }
   0x3   : > { %p313_p1 = scmp.lt.s32.totalorder %s1226_s15, 3 }
   0x5   : > { %p314_p2 = pnand %p1090_p0, %p313_p1 }
   0x6   : > { %p351_p3 = scmp.lt.s32.totalorder (!%p314_p2), %s1086_s16, 1  ;;  %vm365_vm0 = vcmask (!%p314_p2), 1043456   ;;  %v372_v5 = vld [vmem:[%s1462_s3] sm:$0xff] (!%p314_p2)  ;;  %vm400_vm1 = vcmask (!%p314_p2), 31744   ;;  %v377_v6 = vld [vmem:[%s1463_s4 + $0x8] sm:$0xff] (!%p314_p2)  ;;  %v1228_v7 = vmov (!%p314_p2), 0  }
   0x7   : > { %317 = sbr.rel (%p314_p2) target bundleno = 989 (0x3dd), region = 60  ;;  %1139 = vmatprep.mubr.msk.f32.mxu0 (!%p314_p2), %vm400_vm1, %v372_v5  ;;  %1190 = vset.pattern.permute.xlu1 (!%p314_p2), %v1228_v7  ;;  %v376_v8 = vld [vmem:[%s1463_s4] sm:$0xff] (!%p314_p2)  ;;  %v378_v9 = vld [vmem:[%s1463_s4 + $0x10] sm:$0xff] (!%p314_p2)  ;;  %v379_v10 = vld [vmem:[%s1463_s4 + $0x18] sm:$0xff] (!%p314_p2)  ;;  %v1229_v16 = vmov (!%p314_p2), 0.0   ;;  %v1230_v20 = vmov (!%p314_p2), 0.0|0.0  }
   0x8   : > { %1189 = vset.pattern.permute.xlu0 (!%p314_p2), %v1228_v7  ;;  %387 = vperm.xlu1 (!%p314_p2), %1190, %v377_v6   ;;  %v373_v13 = vld [vmem:[%s1462_s3 + $0x8] sm:$0xff] (!%p314_p2)  ;;  %v374_v14 = vld [vmem:[%s1462_s3 + $0x10] sm:$0xff] (!%p314_p2)  ;;  %v375_v15 = vld [vmem:[%s1462_s3 + $0x18] sm:$0xff] (!%p314_p2)  ;;  %757 = vst [vmem:[#allocation2] sm:$0xff] (!%p314_p2), %v1229_v16  ;;  %vm1231_vm2 = vmmov (!%p314_p2), 0   ;;  %vm536_vm3 = vcmask (!%p314_p2), 261120  }
   0x9   : > { %758 = vst [vmem:[#allocation2 + $0x8] sm:$0xff] (!%p314_p2), %v1229_v16  ;;  %760 = vst [vmem:[#allocation2 + $0x18] sm:$0xff] (!%p314_p2), %v1229_v16  ;;  %v618_v17 = vld [vmem:[%s1466_s7] sm:$0xff] (!%p314_p2)  ;;  %v619_v18 = vld [vmem:[%s1466_s7 + $0x8] sm:$0xff] (!%p314_p2)  ;;  %1156 = vmatprep.subr.bf16.mxu1 (!%p314_p2), %v1230_v20  ;;  %1153 = vmatprep.mubr.msk.f32.mxu1 (!%p314_p2), %vm1231_vm2, %v1229_v16  ;;  %s1232_s14 = smov (!%p314_p2), 48   ;;  %s1233_s17 = smov (!%p314_p2), 32  }
   0xa   : > { %v620_v19 = vld [vmem:[%s1466_s7 + $0x10] sm:$0xff] (!%p314_p2)  ;;  %v621_v21 = vld [vmem:[%s1466_s7 + $0x18] sm:$0xff] (!%p314_p2)  ;;  %v529_v56 = vld [vmem:[%s1464_s5] sm:$0xf] (!%p314_p2)  ;;  %s1234_s18 = smov (!%p314_p2), 16   ;;  %vm778_vm4 = vcmask (!%p314_p2), 1047936  }
   0xb   : > { %v622_v57 = vld [vmem:[%s1466_s7 + $0x20] sm:$0xff] (!%p314_p2)  ;;  %v623_v58 = vld [vmem:[%s1466_s7 + $0x28] sm:$0xff] (!%p314_p2)  ;;  %v624_v59 = vld [vmem:[%s1466_s7 + $0x30] sm:$0xff] (!%p314_p2)  ;;  %vm770_vm5 = vcmask (!%p314_p2), 392192   ;;  %vm798_vm6 = vcmask (!%p314_p2), 1047808   ;;  %vm811_vm7 = vcmask (!%p314_p2), 130048  }
   0xc   : > { %392 = vperm.xlu1 (!%p314_p2), %1190, %v378_v9   ;;  %vm819_vm8 = vcmask (!%p314_p2), 1047680   ;;  %s1236_s20 = smov (!%p314_p2), 96   ;;  %s1237_s21 = smov (!%p314_p2), 80   ;;  %vm846_vm9 = vcmask (!%p314_p2), 1048448   ;;  %vm838_vm10 = vcmask (!%p314_p2), 916480   ;;  %vm859_vm11 = vcmask (!%p314_p2), 785408  }
   0xd   : > { %vm867_vm12 = vcmask (!%p314_p2), 1048320   ;;  %vm880_vm13 = vcmask (!%p314_p2), 654336   ;;  %vm888_vm14 = vcmask (!%p314_p2), 1048192   ;;  %s1238_s24 = smov (!%p314_p2), 2   ;;  %s1239_s25 = smov (!%p314_p2), 3   ;;  %vm911_vm15 = vcmask (!%p314_p2), 15360  }
   0xe   : > { %s1471_s16 = smov (!%p351_p3, %s1086_s16), 1  ;;  %s1240_s26 = smov 127   ;;  %vm943_vm2 = vcmask 1039360  }
   0xf   : > { %s1125_s9 = sshll.u32 %s1471_s16, 3  ;;  %s1241_s27 = smov 1  }
  0x10   : > { %s355_s19 = scalar_lea.vmem %s1459_s0, %s1125_s9  ;;  %397 = vperm.xlu1 %1190, %v379_v10   ;;  %s1242_s28 = smov 125  }
  0x11   : > { %v1319_v0 = vld [vmem:[%s355_s19] sm:$0xff]  ;;  %s1235_s19 = smov 112   ;;  %s1243_s29 = smov 126  }
  0x12   : > { %v1323_v1 = vcombine.high %v1319_v0, %v1319_v0  ;;  %v366_v2 = vsel %vm365_vm0, %v1319_v0, 0.0  ;;  %s360_s13 = scalar_lea.vmem %s1469_s10, %s1125_s9 }
  0x14   : > { %v367_v3 = vsel %vm365_vm0, %v1323_v1, 0.0 }
  0x15   : > { %v368_v4 = vadd.f32 %v367_v3, %v366_v2 }
  0x17   : > { %369 = vadd.xlane.f32.xlu0 %v368_v4 }
  0x2d   : > { %382 = vperm.xlu0 %1189, %v376_v8  }
  0x87   : > { %v388_v22 = vpop.permute.xlu1 %387 }
  0x8b   : > { %v393_v23 = vpop.permute.xlu1 %392 }
  0x8f   : > { %v398_v30 = vpop.permute.xlu1 %397 }
  0xa4   : > { %v370_v11 = vpop.xlane.xlu0 %369 }
  0xa5   : > { %v371_v12 = vmul.f32 0.00390625, %v370_v11 }
  0xa7   : > { %1137 = vmatprep.subr.msk.mxu0 %vm365_vm0, %v371_v12 }
  0xa8   : > { %1138 = vmatpush3.msk.msra.mxu0 %vm365_vm0, %v371_v12 }
  0xa9   : > { %1140 = vmatmul.mubr.msk.f32.vlgmr.msra.gmra.mrb[0].mxu0 %vm400_vm1, %v373_v13  ;;  %1106 = vmatprep.subr.msk.mxu0 %vm365_vm0, %v1323_v1 }
  0xaa   : > { %1142 = vmatprep.mubr.msk.f32.mxu0 %vm400_vm1, %v374_v14  ;;  %1107 = vmatpush1.msk.msra.mxu0 %vm365_vm0, %v1319_v0 }
  0xac   : > { %v383_v24 = vpop.permute.xlu0 %382 }
  0xad   : > { %1143 = vmatmul.mubr.msk.f32.gmra.mrb[2].mxu0 %vm400_vm1, %v375_v15 }
  0xae   : > { %714 = vmatprep.mubr.f32.mxu0 %v1229_v16 }
  0xb1   : > { %1108 = vmatmul.mubr.msk.f32.vlgmr.msra.gmra.mrb[4].mxu0 %vm400_vm1, %v618_v17 }
  0xb2   : > { %720 = vmatprep.mubr.f32.mxu0 %v1229_v16 }
  0xb5   : > { %1109 = vmatmul.mubr.msk.f32.gmra.mrb[6].mxu0 %vm400_vm1, %v619_v18 }
  0xb6   : > { %726 = vmatprep.mubr.f32.mxu0 %v1229_v16 }
  0xb9   : > { %1110 = vmatmul.mubr.msk.f32.gmra.mrb[8].mxu0 %vm400_vm1, %v620_v19 }
  0xba   : > { %732 = vmatprep.mubr.f32.mxu0 %v1229_v16 }
  0xbd   : > { %1111 = vmatmul.mubr.msk.f32.gmra.mrb[10].mxu0 %vm400_vm1, %v621_v21 }
 0x17c   : > { %v1141_v25 = vpop.f32.mrb[0].mxu0 }
 0x17d   : > { %v488_v26 = vadd.f32 %v1141_v25, %v388_v22  ;;  %v482_v27 = vpop.f32.mrb[1].mxu0 }
 0x17e   : > { %v483_v28 = vadd.f32 %v482_v27, %v383_v24 }
 0x17f   : > { %v1101_v29 = vmul.f32 -1.442695, %v488_v26 }
 0x180   : > { %v1100_v31 = vmul.f32 -1.442695, %v483_v28  ;;  %v1144_v32 = vpop.f32.mrb[2].mxu0 }
 0x181   : > { %1192 = vpow2.f32 %v1101_v29  ;;  %v498_v33 = vadd.f32 %v1144_v32, %v398_v30  ;;  %v492_v34 = vpop.f32.mrb[3].mxu0 }
 0x182   : > { %1194 = vpow2.f32 %v1100_v31  ;;  %v493_v35 = vadd.f32 %v492_v34, %v393_v23 }
 0x183   : > { %v1103_v36 = vmul.f32 -1.442695, %v498_v33 }
 0x184   : > { %v1102_v37 = vmul.f32 -1.442695, %v493_v35  ;;  %v716_v60 = vpop.f32.mrb[4].mxu0 }
 0x185   : > { %1196 = vpow2.f32 %v1103_v36  ;;  %766 = vrot.lane.b32.xlu1 %v716_v60, %s1232_s14  ;;  %v718_v61 = vpop.f32.mrb[5].mxu0 }
 0x186   : > { %1198 = vpow2.f32 %v1102_v37 }
 0x188   : > { %v722_v62 = vpop.f32.mrb[6].mxu0 }
 0x189   : > { %768 = vrot.lane.b32.xlu1 %v718_v61, %s1232_s14  ;;  %v724_v63 = vpop.f32.mrb[7].mxu0 }
 0x18b   : > { %v1193_v38 = vpop.eup %1192 }
 0x18c   : > { %v1195_v39 = vpop.eup %1194  ;;  %v514_v40 = vadd.f32 1.0, %v1193_v38 }
 0x18d   : > { %v513_v41 = vadd.f32 1.0, %v1195_v39  ;;  %787 = vrot.lane.b32.xlu1 %v722_v62, %s1233_s17 }
 0x18e   : > { %1200 = vrcp.f32 %v514_v40 }
 0x18f   : > { %v1197_v42 = vpop.eup %1196  ;;  %1202 = vrcp.f32 %v513_v41 }
 0x190   : > { %v1199_v43 = vpop.eup %1198  ;;  %v516_v44 = vadd.f32 1.0, %v1197_v42 }
 0x191   : > { %v515_v45 = vadd.f32 1.0, %v1199_v43  ;;  %789 = vrot.lane.b32.xlu1 %v724_v63, %s1233_s17 }
 0x192   : > { %1204 = vrcp.f32 %v516_v44 }
 0x193   : > { %1206 = vrcp.f32 %v515_v45 }
 0x198   : > { %v1201_v46 = vpop.eup %1200 }
 0x199   : > { %v1203_v47 = vpop.eup %1202  ;;  %v526_v48 = vmul.f32 %v1201_v46, %v488_v26 }
 0x19a   : > { %v525_v49 = vmul.f32 %v1203_v47, %v483_v28 }
 0x19c   : > { %v1205_v50 = vpop.eup %1204  ;;  %v1157_v51 = vpack.c.bf16 %v526_v48, %v525_v49 }
 0x19d   : > { %v1207_v52 = vpop.eup %1206  ;;  %v528_v53 = vmul.f32 %v1205_v50, %v498_v33  ;;  %v530_v33 = vld [vmem:[%s1465_s6] sm:$0xf] }
 0x19e   : > { %v527_v54 = vmul.f32 %v1207_v52, %v493_v35  ;;  %1158 = vmatpush3.bf16.msra.mxu1 %v1157_v51 }
 0x19f   : > { %1159 = vmatprep.subr.bf16.mxu1 %v1230_v20 }
 0x1a0   : > { %v1160_v55 = vpack.c.bf16 %v528_v53, %v527_v54 }
 0x1a2   : > { %1161 = vmatpush3.bf16.msra.mxu1 %v1160_v55 }
 0x1a3   : > { %1162 = vmatprep.subr.msk.mxu1 %vm365_vm0, %v1323_v1  ;;  %v728_v1 = vpop.f32.mrb[8].mxu0 }
 0x1a4   : > { %807 = vrot.lane.b32.xlu1 %v728_v1, %s1234_s18  ;;  %v730_v2 = vpop.f32.mrb[9].mxu0 }
 0x1a5   : > { %1154 = vmatmul.mubr.msk.f32.vlgmr.msra.gmra.mrb[0].mxu1 %vm536_vm3, %v529_v56  ;;  %v1410_v3 = vpop.f32.mrb[10].mxu0 }
 0x1a6   : > { %1163 = vmatpush1.msk.msra.mxu1 %vm365_vm0, %v1319_v0  ;;  %738 = vmatprep.mubr.f32.mxu1 %v1229_v16  ;;  %v736_v4 = vpop.f32.mrb[11].mxu0  ;;  %vm898_vm0 = vcmask 23552  }
 0x1a8   : > { %809 = vrot.lane.b32.xlu1 %v730_v2, %s1234_s18 }
 0x1a9   : > { %1112 = vmatmul.mubr.msk.f32.vlgmr.msra.gmra.mrb[2].mxu1 %vm400_vm1, %v622_v57 }
 0x1aa   : > { %744 = vmatprep.mubr.f32.mxu1 %v1229_v16 }
 0x1ad   : > { %1113 = vmatmul.mubr.msk.f32.gmra.mrb[4].mxu1 %vm400_vm1, %v623_v58 }
 0x1ae   : > { %750 = vmatprep.mubr.f32.mxu1 %v1229_v16 }
 0x1b1   : > { %1114 = vmatmul.mubr.msk.f32.gmra.mrb[6].mxu1 %vm400_vm1, %v624_v59  ;;  %vm924_vm1 = vcmask 7168  }
 0x1f7   : > { %v767_v5 = vpop.permute.xlu1 %766 }
 0x1f8   : > { %779 = vst.msk [vmem:[#allocation2 + $0x8] sm:$0xff] %vm778_vm4, %v767_v5  ;;  %vm969_vm4 = vcmask 1022976  }
 0x1fb   : > { %v769_v6 = vpop.permute.xlu1 %768 }
 0x1fc   : > { %781 = vst.msk [vmem:[#allocation2 + $0x18] sm:$0xff] %vm770_vm5, %v769_v6  ;;  %v771_v9 = vsel %vm770_vm5, %v767_v5, %v769_v6  ;;  %v616_v6 = vld [vmem:[%s1460_s1] sm:$0xf] }
 0x1ff   : > { %v788_v7 = vpop.permute.xlu1 %787  ;;  %v782_v8 = vld [vmem:[#allocation2 + $0x8] sm:$0xff] }
 0x200   : > { %v795_v10 = vadd.f32 %v788_v7, %v782_v8 }
 0x202   : > { %799 = vst.msk [vmem:[#allocation2 + $0x8] sm:$0xff] %vm798_vm6, %v795_v10 }
 0x203   : > { %v790_v11 = vpop.permute.xlu1 %789  ;;  %v784_v12 = vld [vmem:[#allocation2 + $0x18] sm:$0xff] }
 0x204   : > { %v791_v13 = vsel %vm536_vm3, %v788_v7, %v790_v11  ;;  %v797_v14 = vadd.f32 %v790_v11, %v784_v12 }
 0x205   : > { %v796_v16 = vadd.f32 %v791_v13, %v771_v9  ;;  %v1115_v9 = vld [vmem:[%s1467_s8 + $0x1] ss:$8 sm:$0x3]  ;;  %v893_v13 = vld [vmem:[%s1467_s8] ss:$8 sm:$0x3] }
 0x206   : > { %801 = vst.msk [vmem:[#allocation2 + $0x18] sm:$0xff] %vm536_vm3, %v797_v14  ;;  %vm956_vm3 = vcmask 1031168  }
 0x209   : > { %v802_v17 = vld [vmem:[#allocation2 + $0x8] sm:$0xff] }
 0x20d   : > { %v804_v22 = vld [vmem:[#allocation2 + $0x18] sm:$0xff] }
 0x216   : > { %v808_v15 = vpop.permute.xlu1 %807 }
 0x217   : > { %v816_v19 = vadd.f32 %v808_v15, %v802_v17 }
 0x219   : > { %820 = vst.msk [vmem:[#allocation2 + $0x8] sm:$0xff] %vm819_vm8, %v816_v19 }
 0x21a   : > { %v810_v18 = vpop.permute.xlu1 %809 }
 0x21b   : > { %v812_v20 = vsel %vm811_vm7, %v808_v15, %v810_v18  ;;  %v818_v24 = vadd.f32 %v810_v18, %v804_v22  ;;  %v1116_v22 = vld [vmem:[%s1467_s8 + $0x2] ss:$8 sm:$0x3] }
 0x21c   : > { %v817_v21 = vadd.f32 %v812_v20, %v796_v16 }
 0x21d   : > { %822 = vst.msk [vmem:[#allocation2 + $0x18] sm:$0xff] %vm811_vm7, %v818_v24 }
 0x21e   : > { %v826_v23 = vadd.f32 %v817_v21, %v736_v4  ;;  %v1008_v4 = vld [vmem:[%s1461_s2] sm:$0xf] }
 0x220   : > { %828 = vst [vmem:[#allocation2 + $0x10] sm:$0xff] %v826_v23  ;;  %v823_v36 = vld [vmem:[#allocation2 + $0x8] sm:$0xff] }
 0x221   : > { %v825_v40 = vadd.f32 %v823_v36, %v1410_v3 }
 0x278   : > { %v606_v25 = vpop.f32.mrb[0].mxu1 }
 0x279   : > { %v1155_v26 = vpop.f32.mrb[1].mxu1 }
 0x27c   : > { %v740_v27 = vpop.f32.mrb[2].mxu1 }
 0x27d   : > { %834 = vrot.lane.b32.xlu1 %v740_v27, %s1235_s19  ;;  %v742_v28 = vpop.f32.mrb[3].mxu1 }
 0x280   : > { %v746_v29 = vpop.f32.mrb[4].mxu1 }
 0x281   : > { %836 = vrot.lane.b32.xlu1 %v742_v28, %s1235_s19  ;;  %v748_v30 = vpop.f32.mrb[5].mxu1  ;;  %v1118_v28 = vld [vmem:[%s1467_s8 + $0x4] ss:$8 sm:$0x3] }
 0x282   : > { %857 = vrot.lane.b32.xlu0 %v748_v30, %s1236_s20 }
 0x284   : > { %v752_v31 = vpop.f32.mrb[6].mxu1 }
 0x285   : > { %855 = vrot.lane.b32.xlu1 %v746_v29, %s1236_s20  ;;  %v754_v32 = vpop.f32.mrb[7].mxu1 }
 0x286   : > { %878 = vrot.lane.b32.xlu0 %v754_v32, %s1237_s21 }
 0x289   : > { %876 = vrot.lane.b32.xlu1 %v752_v31, %s1237_s21 }
 0x28d   : > { %533 = vperm.xlu1 %1190, %v530_v33  }
 0x2ef   : > { %v835_v34 = vpop.permute.xlu1 %834 }
 0x2f0   : > { %847 = vst.msk [vmem:[#allocation2] sm:$0xff] %vm846_vm9, %v835_v34 }
 0x2f3   : > { %v837_v35 = vpop.permute.xlu1 %836 }
 0x2f4   : > { %v845_v37 = vadd.f32 %v837_v35, %v826_v23  ;;  %v858_v38 = vpop.permute.xlu0 %857  ;;  %v839_v39 = vsel %vm838_vm10, %v835_v34, %v837_v35 }
 0x2f5   : > { %v844_v43 = vadd.f32 %v839_v39, %v825_v40 }
 0x2f6   : > { %849 = vst.msk [vmem:[#allocation2 + $0x10] sm:$0xff] %vm838_vm10, %v845_v37  ;;  %v1119_v37 = vld [vmem:[%s1467_s8 + $0x5] ss:$8 sm:$0x3] }
 0x2f7   : > { %v856_v41 = vpop.permute.xlu1 %855  ;;  %v850_v44 = vld [vmem:[#allocation2] sm:$0xff] }
 0x2f8   : > { %v860_v42 = vsel %vm859_vm11, %v856_v41, %v858_v38  ;;  %v879_v45 = vpop.permute.xlu0 %878  ;;  %v864_v46 = vadd.f32 %v856_v41, %v850_v44  ;;  %v1120_v41 = vld [vmem:[%s1467_s8 + $0x6] ss:$8 sm:$0x3] }
 0x2f9   : > { %v865_v47 = vadd.f32 %v860_v42, %v844_v43 }
 0x2fa   : > { %868 = vst.msk [vmem:[#allocation2] sm:$0xff] %vm867_vm12, %v864_v46 }
 0x2fb   : > { %v877_v48 = vpop.permute.xlu1 %876 }
 0x2fc   : > { %v881_v49 = vsel %vm880_vm13, %v877_v48, %v879_v45 }
 0x2fd   : > { %v852_v50 = vld [vmem:[#allocation2 + $0x10] sm:$0xff]  ;;  %v886_v51 = vadd.f32 %v881_v49, %v865_v47 }
 0x2fe   : > { %v866_v52 = vadd.f32 %v858_v38, %v852_v50 }
 0x2ff   : > { %890 = vst [vmem:[#allocation2 + $0x8] sm:$0xff] %v886_v51 }
 0x300   : > { %870 = vst.msk [vmem:[#allocation2 + $0x10] sm:$0xff] %vm859_vm11, %v866_v52 }
 0x301   : > { %v871_v53 = vld [vmem:[#allocation2] sm:$0xff] }
 0x302   : > { %v885_v54 = vadd.f32 %v877_v48, %v871_v53  ;;  %v984_v53 = vlaneseq }
 0x304   : > { %889 = vst.msk [vmem:[#allocation2] sm:$0xff] %vm888_vm14, %v885_v54  ;;  %v985_v54 = vshrl.u32 %v984_v53, 7 }
 0x307   : > { %v873_v55 = vld [vmem:[#allocation2 + $0x10] sm:$0xff] }
 0x308   : > { %v887_v56 = vadd.f32 %v879_v45, %v873_v55  ;;  %v1244_v55 = vmov 839922192  }
 0x30a   : > { %891 = vst.msk [vmem:[#allocation2 + $0x10] sm:$0xff] %vm880_vm13, %v887_v56  ;;  %v1000_v56 = vunpack.c.l.s4 %v1244_v55 }
 0x30c   : > { %v534_v57 = vpop.permute.xlu1 %533 }
 0x30d   : > { %v607_v58 = vadd.f32 %v606_v25, %v534_v57  ;;  %v1117_v25 = vld [vmem:[%s1467_s8 + $0x3] ss:$8 sm:$0x3]  ;;  %v986_v57 = vsub.s32 0, %v985_v54 }
 0x30f   : > { %v1105_v59 = vmul.f32 -1.442695, %v607_v58  ;;  %v990_v58 = vsub.s32 1, %v985_v54 }
 0x311   : > { %1208 = vpow2.f32 %v1105_v59  ;;  %v904_v60 = vld [vmem:[#allocation2 + $0x1] ss:$8 sm:$0x7]  ;;  %v892_v61 = vld [vmem:[#allocation2] ss:$8 sm:$0x7]  ;;  %v1001_v59 = vunpack.c.0.s8 %v1000_v56 }
 0x312   : > { %908 = vrot.lane.b32.xlu1 %v904_v60, %s1238_s24  ;;  %895 = vrot.lane.b32.xlu0 %v892_v61, %s1239_s25  ;;  %v936_v62 = vld [vmem:[#allocation2 + $0xc] ss:$8 sm:$0x7]  ;;  %v917_v63 = vld [vmem:[#allocation2 + $0x2] ss:$8 sm:$0x7] }
 0x313   : > { %v962_v1 = vld [vmem:[#allocation2 + $0xe] ss:$8 sm:$0x7]  ;;  %v949_v2 = vld [vmem:[#allocation2 + $0xd] ss:$8 sm:$0x7] }
 0x314   : > { %v930_v24 = vld [vmem:[#allocation2 + $0xb] ss:$8 sm:$0x3] }
 0x315   : > { %v933_v35 = vmul.f32 %v1117_v25, %v930_v24 }
 0x316   : > { %940 = vrot.lane.b32.xlu1 %v936_v62, %s1240_s26  ;;  %921 = vrot.lane.b32.xlu0 %v917_v63, %s1241_s27  ;;  %s974_s26 = sld [smem:[#allocation3]] }
 0x31a   : > { %966 = vrot.lane.b32.xlu1 %v962_v1, %s1242_s28  ;;  %953 = vrot.lane.b32.xlu0 %v949_v2, %s1243_s29  ;;  %v1004_v1 = vsub.s32 %v1001_v59, %v985_v54 }
 0x31b   : > { %v1209_v3 = vpop.eup %1208 }
 0x31c   : > { %v613_v5 = vadd.f32 1.0, %v1209_v3  ;;  %v975_v47 = vstv %s974_s26 }
 0x31e   : > { %1210 = vrcp.f32 %v613_v5  ;;  %1011 = vperm.xlu1 %1190, %v1008_v4  }
 0x328   : > { %v1211_v7 = vpop.eup %1210 }
 0x329   : > { %v617_v8 = vmul.f32 %v1211_v7, %v616_v6 }
 0x32b   : > { %997 = vperm.xlu0 %1189, %v617_v8  }
 0x384   : > { %v909_v10 = vpop.permute.xlu1 %908  ;;  %v896_v11 = vpop.permute.xlu0 %895 }
 0x385   : > { %v910_v12 = vrot.slane %v909_v10, 1  ;;  %v897_v14 = vrot.slane %v896_v11, 1 }
 0x387   : > { %v912_v15 = vsel %vm911_vm15, %v909_v10, %v910_v12  ;;  %v899_v16 = vsel %vm898_vm0, %v896_v11, %v897_v14 }
 0x388   : > { %v914_v17 = vmul.f32 %v1115_v9, %v912_v15  ;;  %v901_v18 = vmul.f32 %v899_v16, %v893_v13  ;;  %v941_v19 = vpop.permute.xlu1 %940  ;;  %v922_v20 = vpop.permute.xlu0 %921 }
 0x389   : > { %v942_v21 = vrot.slane %v941_v19, 1  ;;  %v923_v23 = vrot.slane %v922_v20, 1 }
 0x38a   : > { %v915_v27 = vadd.f32 %v914_v17, %v901_v18 }
 0x38b   : > { %v925_v26 = vsel %vm924_vm1, %v922_v20, %v923_v23  ;;  %v944_v32 = vsel %vm943_vm2, %v941_v19, %v942_v21 }
 0x38c   : > { %v927_v29 = vmul.f32 %v1116_v22, %v925_v26  ;;  %v967_v30 = vpop.permute.xlu1 %966  ;;  %v954_v31 = vpop.permute.xlu0 %953  ;;  %v946_v39 = vmul.f32 %v1118_v28, %v944_v32 }
 0x38d   : > { %v968_v33 = vrot.slane %v967_v30, 1  ;;  %v955_v34 = vrot.slane %v954_v31, 1 }
 0x38e   : > { %v928_v36 = vadd.f32 %v927_v29, %v915_v27 }
 0x38f   : > { %v957_v38 = vsel %vm956_vm3, %v954_v31, %v955_v34  ;;  %v970_v42 = vsel %vm969_vm4, %v967_v30, %v968_v33 }
 0x390   : > { %v934_v40 = vadd.f32 %v933_v35, %v928_v36  ;;  %v959_v44 = vmul.f32 %v1119_v37, %v957_v38  ;;  %v972_v45 = vmul.f32 %v1120_v41, %v970_v42 }
 0x392   : > { %v947_v43 = vadd.f32 %v946_v39, %v934_v40 }
 0x394   : > { %v960_v46 = vadd.f32 %v959_v44, %v947_v43 }
 0x396   : > { %v973_v48 = vadd.f32 %v972_v45, %v960_v46 }
 0x398   : > { %v976_v49 = vadd.f32 %v975_v47, %v973_v48 }
 0x39a   : > { %v1121_v50 = vmul.f32 -1.442695, %v976_v49 }
 0x39c   : > { %1212 = vpow2.f32 %v1121_v50 }
 0x39d   : > { %v1012_v3 = vpop.permute.xlu1 %1011 }
 0x39e   : > { %v1019_v6 = vrot.slane %v1012_v3, %v1004_v1 }
 0x3a6   : > { %v1213_v51 = vpop.eup %1212 }
 0x3a7   : > { %v980_v52 = vadd.f32 1.0, %v1213_v51 }
 0x3a9   : > { %1214 = vrcp.f32 %v980_v52 }
 0x3aa   : > { %v998_v63 = vpop.permute.xlu0 %997 }
 0x3ab   : > { %v1005_v5 = vrot.slane %v998_v63, %v1004_v1 }
 0x3b3   : > { %v1215_v60 = vpop.eup %1214 }
 0x3b4   : > { %v987_v61 = vrot.slane %v1215_v60, %v986_v57  ;;  %v991_v62 = vrot.slane %v1215_v60, %v990_v58 }
 0x3b6   : > { %v992_v2 = vcombine.low %v987_v61, %v991_v62 }
 0x3b8   : > { %v994_v4 = vmul.f32 %v992_v2, %v1319_v0 }
 0x3ba   : > { %v1007_v7 = vmul.f32 %v1005_v5, %v994_v4 }
 0x3bc   : > { %v1021_v8 = vadd.f32 %v1019_v6, %v1007_v7 }
 0x3be   : > { %v1022_v9 = vadd.f32 %v1021_v8, %v1319_v0 }
 0x3c0   : > { %v1122_v10 = vmul.f32 -1.442695, %v1022_v9 }
 0x3c2   : > { %1216 = vpow2.f32 %v1122_v10 }
 0x3cc   : > { %v1217_v11 = vpop.eup %1216 }
 0x3cd   : > { %v1026_v12 = vadd.f32 1.0, %v1217_v11 }
 0x3cf   : > { %1218 = vrcp.f32 %v1026_v12 }
 0x3d9   : > { %v1219_v13 = vpop.eup %1218 }
 0x3da   : > { %v1029_v14 = vmul.f32 %v1219_v13, %v1022_v9 }
 0x3dc   : > { %1030 = vst [vmem:[%s360_s13] sm:$0xff] %v1029_v14 }
 0x3dd PF: > { %s21_s15 = sadd.s32 1, %s1226_s15  }
 0x3de   : > { %p18_p4 = scmp.ge.s32.totalorder %s21_s15, 4  }
 0x3e0   :  { %20 = sbr.rel (!%p18_p4) target bundleno = 2 (0x2), region = 102 }

</bundles_post_ra>
